<compile_context>
chip_gen: v5e
topology: v5e:2x2
jax: 0.10.0
libtpu: 0.0.40
codegen_flags: <defaults>
</compile_context>

<pallas_src>
import math

import jax
import jax.numpy as jnp
from jax.experimental import pallas as pl
from jax.experimental.pallas import tpu as pltpu


_SQRT_2_OVER_PI = math.sqrt(2.0 / math.pi)


def _gelu_tanh(x):
    # Matches torch.nn.GELU(approximate='tanh'); tanh lands on the EUP slot.
    return 0.5 * x * (1.0 + jnp.tanh(_SQRT_2_OVER_PI * (x + 0.044715 * x * x * x)))


def _round_up(x, m):
    return ((x + m - 1) // m) * m


def _vmem_limit_bytes():
    # ~3/4 of physical VMEM, capped at 100 MiB. Fall back to device_kind if
    # get_tpu_info() is unavailable (v7x: 64 MiB phys, v5e/v6e: 128 MiB).
    cap = None
    try:
        cap = getattr(pltpu.get_tpu_info(), "vmem_capacity_bytes", None)
    except Exception:
        cap = None
    if not cap:
        kind = ""
        try:
            kind = jax.devices()[0].device_kind.lower()
        except Exception:
            pass
        cap = (64 << 20) if "v7" in kind else (128 << 20)
    return int(min(cap * 3 // 4, 100 << 20))


def _pick_m_tile(M, align=16, target=512):
    # bf16 operands -> 16-row sublane alignment. Target 512-row tiles; for
    # small M, split into >=2 row blocks so the "parallel" axis can shard
    # across v7x's 2 TensorCores.
    if M <= target:
        if M >= 2 * align:
            return _round_up((M + 1) // 2, align)
        return _round_up(M, align)
    return target


def _estimate_vmem_bytes(tm, C, hk, nh, out_itemsize):
    bf = 2  # bf16 operand bytes
    x_buf = 2 * tm * C * bf                       # double-buffered x tile
    o_buf = 2 * tm * C * out_itemsize             # double-buffered out tile
    wfc_buf = 2 * C * hk * bf                     # streamed w_fc chunk
    wproj_buf = 2 * hk * C * bf                   # streamed w_proj chunk
    bfc_buf = 2 * 8 * max(_round_up(hk, 128), 128) * 4
    bproj_buf = 2 * 8 * max(_round_up(C, 128), 128) * 4
    acc = tm * C * 4 if nh > 1 else 0             # f32 accumulator scratch
    temps = tm * hk * (4 + bf)                    # hid (f32) + gelu out (bf16)
    return x_buf + o_buf + wfc_buf + wproj_buf + bfc_buf + bproj_buf + acc + temps


def _pick_h_chunk(H, C, tm, out_itemsize, budget):
    # Prefer hk == H (no accumulator RMW); otherwise the largest 128-aligned
    # divisor of H whose working set fits ~80% of the VMEM budget.
    cands = [H]
    hk = (min(H, 2048) // 128) * 128
    while hk >= 128:
        if hk < H and H % hk == 0:
            cands.append(hk)
        hk -= 128
    for hk in cands:
        nh = H // hk
        if _estimate_vmem_bytes(tm, C, hk, nh, out_itemsize) <= int(budget * 0.8):
            return hk
    return cands[-1]


# ----------------------------- kernel bodies ------------------------------ #

def _mlp_kernel_fused(x_ref, wfc_ref, bfc_ref, wproj_ref, bproj_ref, o_ref):
    # hk == H: one pass, no scratch, no accumulator traffic.
    hid = jnp.dot(x_ref[...], wfc_ref[...], preferred_element_type=jnp.float32)
    g = _gelu_tanh(hid + bfc_ref[...])                      # f32 bias + GELU
    out = jnp.dot(g.astype(wproj_ref.dtype), wproj_ref[...],
                  preferred_element_type=jnp.float32) + bproj_ref[...]
    o_ref[...] = out.astype(o_ref.dtype)


def _mlp_kernel_chunked(x_ref, wfc_ref, bfc_ref, wproj_ref, bproj_ref, o_ref,
                        acc_ref):
    # Hidden dim streamed on grid axis 1; f32 accumulator kept in VMEM scratch.
    k = pl.program_id(1)
    hid = jnp.dot(x_ref[...], wfc_ref[...], preferred_element_type=jnp.float32)
    g = _gelu_tanh(hid + bfc_ref[...])
    partial = jnp.dot(g.astype(wproj_ref.dtype), wproj_ref[...],
                      preferred_element_type=jnp.float32)

    @pl.when(k == 0)
    def _():
        # Peeled first chunk: fold the output bias into the init; no zero-store.
        acc_ref[...] = partial + bproj_ref[...]

    @pl.when(k != 0)
    def _():
        acc_ref[...] += partial

    @pl.when(k == pl.num_programs(1) - 1)
    def _():
        o_ref[...] = acc_ref[...].astype(o_ref.dtype)


# ------------------------------ pallas_call ------------------------------- #

def _build_call(Mp, C, H, tm, hk, out_dtype):
    nh = H // hk
    chunked = nh > 1
    kernel = _mlp_kernel_chunked if chunked else _mlp_kernel_fused
    scratch = [pltpu.VMEM((tm, C), jnp.float32)] if chunked else []

    flops = 4 * Mp * C * H  # two matmuls, 2*M*C*H flops each
    bytes_accessed = (Mp * C * (2 + jnp.dtype(out_dtype).itemsize)  # x in, out
                      + 2 * C * H * 2                               # bf16 weights
                      + (H + C) * 4)                                # f32 biases

    return pl.pallas_call(
        kernel,
        out_shape=jax.ShapeDtypeStruct((Mp, C), out_dtype),
        grid_spec=pltpu.PrefetchScalarGridSpec(
            num_scalar_prefetch=0,
            grid=(Mp // tm, nh),
            in_specs=[
                # x: streamed per row tile (auto double-buffered).
                pl.BlockSpec((tm, C), lambda i, k: (i, 0)),
                # Weight / bias chunks stream along the reduction axis.
                pl.BlockSpec((C, hk), lambda i, k: (0, k)),
                pl.BlockSpec((1, hk), lambda i, k: (0, k)),
                pl.BlockSpec((hk, C), lambda i, k: (k, 0)),
                pl.BlockSpec((1, C), lambda i, k: (0, 0)),
            ],
            # Same output block across k -> VMEM-resident accumulator target.
            out_specs=pl.BlockSpec((tm, C), lambda i, k: (i, 0)),
            scratch_shapes=scratch,
        ),
        compiler_params=pltpu.CompilerParams(
            dimension_semantics=("parallel", "arbitrary"),
            vmem_limit_bytes=_vmem_limit_bytes(),
        ),
        cost_estimate=pl.CostEstimate(
            flops=flops,
            transcendentals=Mp * H,              # one tanh per hidden element
            bytes_accessed=bytes_accessed,
        ),
    )


def mlp_forward(x, w_fc, b_fc, w_proj, b_proj, *, h_chunk=None):
    """x: [B, T, C]; w_fc: [C, H]; b_fc: [H]; w_proj: [H, C]; b_proj: [C].

    Weights are stored (in, out) — the transpose of nn.Linear's (out, in)
    layout — so the kernel computes x @ W. Matmul operands run in bf16 with
    f32 accumulation; biases / GELU / output stay f32-accurate; the result is
    returned in x.dtype.
    """
    B, T, C = x.shape
    H = w_fc.shape[1]
    assert w_fc.shape == (C, H), f"w_fc must be (C, H)=(in, out), got {w_fc.shape}"
    assert b_fc.shape == (H,), f"b_fc must be (H,), got {b_fc.shape}"
    assert w_proj.shape == (H, C), f"w_proj must be (H, C)=(in, out), got {w_proj.shape}"
    assert b_proj.shape == (C,), f"b_proj must be (C,), got {b_proj.shape}"

    M = B * T
    out_dtype = x.dtype

    # bf16 matmul operands (MXU peak); biases stay f32.
    x2d = x.reshape(M, C).astype(jnp.bfloat16)
    w_fc_b = w_fc.astype(jnp.bfloat16)
    w_proj_b = w_proj.astype(jnp.bfloat16)
    b_fc_f = b_fc.astype(jnp.float32).reshape(1, H)
    b_proj_f = b_proj.astype(jnp.float32).reshape(1, C)

    tm = _pick_m_tile(M)
    Mp = _round_up(M, tm)
    if Mp != M:
        # Padded rows are computed and discarded.
        x2d = jnp.pad(x2d, ((0, Mp - M), (0, 0)))

    budget = _vmem_limit_bytes()
    if h_chunk is not None:
        hk = h_chunk if (0 < h_chunk <= H and H % h_chunk == 0) else H
    else:
        hk = _pick_h_chunk(H, C, tm, jnp.dtype(out_dtype).itemsize, budget)

    out2d = _build_call(Mp, C, H, tm, hk, out_dtype)(
        x2d, w_fc_b, b_fc_f, w_proj_b, b_proj_f)
    return out2d[:M].reshape(B, T, C)


if __name__ == "__main__":
    # Small but lane-dense config consistent with the module:
    # n_embed=128 -> hidden=512 (real GPT-2 uses 768 -> 3072).
    B, T, C = 2, 8, 128
    H = 4 * C

    key = jax.random.PRNGKey(0)
    kx, kw1, kb1, kw2, kb2 = jax.random.split(key, 5)

    x = jax.random.normal(kx, (B, T, C), dtype=jnp.float32)
    # nn.Linear stores weight as (out, in); we keep (in, out) so the kernel does x @ W.
    w_fc = jax.random.normal(kw1, (C, H), dtype=jnp.float32) * 0.02
    b_fc = jax.random.normal(kb1, (H,), dtype=jnp.float32) * 0.02
    w_proj = jax.random.normal(kw2, (H, C), dtype=jnp.float32) * 0.02
    b_proj = jax.random.normal(kb2, (C,), dtype=jnp.float32) * 0.02

    out = mlp_forward(x, w_fc, b_fc, w_proj, b_proj)
    out = jax.block_until_ready(out)

    # Pure-JAX reference with the same bf16 operand / f32 accumulation recipe.
    xb = x.reshape(-1, C).astype(jnp.bfloat16)
    wfb = w_fc.astype(jnp.bfloat16)
    wpb = w_proj.astype(jnp.bfloat16)
    h_ref = jnp.dot(xb, wfb, preferred_element_type=jnp.float32) + b_fc
    g_ref = _gelu_tanh(h_ref)
    o_ref = (jnp.dot(g_ref.astype(jnp.bfloat16), wpb,
                     preferred_element_type=jnp.float32) + b_proj)
    o_ref = o_ref.astype(x.dtype).reshape(B, T, C)

    err = float(jnp.max(jnp.abs(out - o_ref)))
    assert jnp.allclose(out, o_ref, atol=5e-3, rtol=5e-3), err

    # Also exercise the grid-axis-reduction (chunked-H) path used at real
    # GPT-2 sizes where the weight chunks stream through VMEM.
    out_chunked = mlp_forward(x, w_fc, b_fc, w_proj, b_proj, h_chunk=128)
    out_chunked = jax.block_until_ready(out_chunked)
    err_c = float(jnp.max(jnp.abs(out_chunked - o_ref)))
    assert jnp.allclose(out_chunked, o_ref, atol=5e-3, rtol=5e-3), err_c

    print("KERNEL_OK")
</pallas_src>

<mosaic_0001>
module attributes {stable_mosaic.version = 11 : i64} {
  func.func @_mlp_kernel_fused(%arg0: i32, %arg1: i32, %arg2: memref<16x128xbf16, #tpu.memory_space<vmem>>, %arg3: memref<128x512xbf16, #tpu.memory_space<vmem>>, %arg4: memref<1x512xf32, #tpu.memory_space<vmem>>, %arg5: memref<512x128xbf16, #tpu.memory_space<vmem>>, %arg6: memref<1x128xf32, #tpu.memory_space<vmem>>, %arg7: memref<16x128xf32, #tpu.memory_space<vmem>>) attributes {dimension_semantics = [#tpu.dimension_semantics<parallel>, #tpu.dimension_semantics<arbitrary>], iteration_bounds = array<i64: 1, 1>, scalar_prefetch = 0 : i64, scratch_operands = 0 : i64, tpu.core_type = #tpu.core_type<tc>, window_params = [{transform_indices = @transform_0, window_bounds = array<i64: 16, 128>}, {transform_indices = @transform_1, window_bounds = array<i64: 128, 512>}, {transform_indices = @transform_2, window_bounds = array<i64: 1, 512>}, {transform_indices = @transform_3, window_bounds = array<i64: 512, 128>}, {pipeline_mode = #tpu.pipeline_mode<synchronous>, transform_indices = @transform_4, window_bounds = array<i64: 1, 128>}, {transform_indices = @transform_5, window_bounds = array<i64: 16, 128>}]} {
    %c0 = arith.constant 0 : index
    %c0_0 = arith.constant 0 : index
    %0 = vector.load %arg2[%c0, %c0_0] : memref<16x128xbf16, #tpu.memory_space<vmem>>, vector<16x128xbf16>
    %c0_1 = arith.constant 0 : index
    %c0_2 = arith.constant 0 : index
    %1 = vector.load %arg3[%c0_1, %c0_2] : memref<128x512xbf16, #tpu.memory_space<vmem>>, vector<128x512xbf16>
    %cst = arith.constant dense<0.000000e+00> : vector<16x512xf32>
    %2 = tpu.matmul %0, %1, %cst {dimension_numbers = #tpu.dot_dimension_numbers<[1], [0], [0], [1], [0, 0, 1, 1], [], []>} : vector<16x128xbf16>, vector<128x512xbf16>, vector<16x512xf32> -> vector<16x512xf32>
    %c0_3 = arith.constant 0 : index
    %c0_4 = arith.constant 0 : index
    %3 = vector.load %arg4[%c0_3, %c0_4] : memref<1x512xf32, #tpu.memory_space<vmem>>, vector<1x512xf32>
    %4 = vector.broadcast %3 : vector<1x512xf32> to vector<16x512xf32>
    %5 = arith.addf %2, %4 : vector<16x512xf32>
    %cst_5 = arith.constant 5.000000e-01 : f32
    %6 = vector.broadcast %cst_5 : f32 to vector<16x512xf32>
    %7 = arith.mulf %6, %5 : vector<16x512xf32>
    %cst_6 = arith.constant 4.471500e-02 : f32
    %8 = vector.broadcast %cst_6 : f32 to vector<16x512xf32>
    %9 = arith.mulf %8, %5 : vector<16x512xf32>
    %10 = arith.mulf %9, %5 : vector<16x512xf32>
    %11 = arith.mulf %10, %5 : vector<16x512xf32>
    %12 = arith.addf %5, %11 : vector<16x512xf32>
    %cst_7 = arith.constant 0.797884583 : f32
    %13 = vector.broadcast %cst_7 : f32 to vector<16x512xf32>
    %14 = arith.mulf %13, %12 : vector<16x512xf32>
    %15 = math.tanh %14 : vector<16x512xf32>
    %cst_8 = arith.constant 1.000000e+00 : f32
    %16 = vector.broadcast %cst_8 : f32 to vector<16x512xf32>
    %17 = arith.addf %16, %15 : vector<16x512xf32>
    %18 = arith.mulf %7, %17 : vector<16x512xf32>
    %19 = arith.truncf %18 : vector<16x512xf32> to vector<16x512xbf16>
    %c0_9 = arith.constant 0 : index
    %c0_10 = arith.constant 0 : index
    %20 = vector.load %arg5[%c0_9, %c0_10] : memref<512x128xbf16, #tpu.memory_space<vmem>>, vector<512x128xbf16>
    %cst_11 = arith.constant dense<0.000000e+00> : vector<16x128xf32>
    %21 = tpu.matmul %19, %20, %cst_11 {dimension_numbers = #tpu.dot_dimension_numbers<[1], [0], [0], [1], [0, 0, 1, 1], [], []>} : vector<16x512xbf16>, vector<512x128xbf16>, vector<16x128xf32> -> vector<16x128xf32>
    %c0_12 = arith.constant 0 : index
    %c0_13 = arith.constant 0 : index
    %22 = vector.load %arg6[%c0_12, %c0_13] : memref<1x128xf32, #tpu.memory_space<vmem>>, vector<1x128xf32>
    %23 = vector.broadcast %22 : vector<1x128xf32> to vector<16x128xf32>
    %24 = arith.addf %21, %23 : vector<16x128xf32>
    %c0_14 = arith.constant 0 : index
    %c0_15 = arith.constant 0 : index
    %25 = vector.load %arg7[%c0_14, %c0_15] : memref<16x128xf32, #tpu.memory_space<vmem>>, vector<16x128xf32>
    tpu.vector_store %arg7[%c0_14, %c0_15], %24 {strides = array<i32>} : memref<16x128xf32, #tpu.memory_space<vmem>>, vector<16x128xf32>,
    return
  }
  func.func @transform_0(%arg0: i32, %arg1: i32) -> (i32, i32) {
    %c0_i32 = arith.constant 0 : i32
    %c0_i32_0 = arith.constant 0 : i32
    return %arg0, %c0_i32 : i32, i32
  }
  func.func @transform_1(%arg0: i32, %arg1: i32) -> (i32, i32) {
    %c0_i32 = arith.constant 0 : i32
    %c0_i32_0 = arith.constant 0 : i32
    return %c0_i32, %arg1 : i32, i32
  }
  func.func @transform_2(%arg0: i32, %arg1: i32) -> (i32, i32) {
    %c0_i32 = arith.constant 0 : i32
    %c0_i32_0 = arith.constant 0 : i32
    return %c0_i32, %arg1 : i32, i32
  }
  func.func @transform_3(%arg0: i32, %arg1: i32) -> (i32, i32) {
    %c0_i32 = arith.constant 0 : i32
    %c0_i32_0 = arith.constant 0 : i32
    return %arg1, %c0_i32 : i32, i32
  }
  func.func @transform_4(%arg0: i32, %arg1: i32) -> (i32, i32) {
    %c0_i32 = arith.constant 0 : i32
    %c0_i32_0 = arith.constant 0 : i32
    %c0_i32_1 = arith.constant 0 : i32
    return %c0_i32, %c0_i32_0 : i32, i32
  }
  func.func @transform_5(%arg0: i32, %arg1: i32) -> (i32, i32) {
    %c0_i32 = arith.constant 0 : i32
    %c0_i32_0 = arith.constant 0 : i32
    return %arg0, %c0_i32 : i32, i32
  }
}

</mosaic_0001>

<bundles_post_ra>
// kernel: tpu_custom_call.1
= control target key start
LH: loop header
LB: loop body
LE: loop exit
PB: predicated region body
PF: predicated region fallthrough
CT: control target
= control target key end

     0   :  { %10 = vsyncpa [#allocation3], 0  ;;  %s1337_s0 = inlined_call_operand.hbm [shape: bf16[16,128], index: 0, kind: input, shape index: {}]   ;;  %s1338_s1 = inlined_call_operand.hbm [shape: bf16[128,512], index: 1, kind: input, shape index: {}]   ;;  %s1339_s2 = inlined_call_operand.hbm [shape: f32[1,512], index: 2, kind: input, shape index: {}]   ;;  %s1340_s3 = inlined_call_operand.hbm [shape: bf16[512,128], index: 3, kind: input, shape index: {}]   ;;  %s1341_s4 = inlined_call_operand.vmem [shape: f32[1,128], index: 4, kind: input, shape index: {}]   ;;  %s1342_s5 = inlined_call_operand.hbm [shape: f32[16,128], index: 5, kind: output, shape index: {}]  }
   0x1   :  { %11 = vsyncpa [#allocation6], 0 }
   0x2   :  { %12 = vsyncpa [#allocation9], 0  ;;  %s31_s20 = sshll.u32 %s1338_s1, 4  ;;  %s32_s20 = int_to_ptr.hbm [resolvable:$true] %s31_s20 }
   0x3   :  { %13 = vsyncpa [#allocation4], 0  ;;  %s1244_s21 = smov [#allocation5]   ;;  %s18_s25 = sshll.u32 %s1337_s0, 4  ;;  %s19_s25 = int_to_ptr.hbm [resolvable:$true] %s18_s25 }
   0x4   :  { %s33_s22 = sshll.u32 %s1244_s21, 4  ;;  %s1245_s26 = smov 256   ;;  %s34_s22 = int_to_ptr.vmem [resolvable:$true] %s33_s22 }
   0x5   :  { %s1246_s27 = smov 16   ;;  %s1247_s28 = smov [#allocation2]  }
   0x6   :  { %39 = dma.hbm_to_vmem [thread:$0]  %s32_s20, 4096, %s34_s22, [#allocation6], %s1245_s26, %s1245_s26, %s1246_s27  }
   0x7   :  { %s20_s29 = sshll.u32 %s1247_s28, 4  ;;  %s1248_s30 = smov 64   ;;  %s21_s29 = int_to_ptr.vmem [resolvable:$true] %s20_s29 }
   0x8   :  { %s1249_s6 = smov 4   ;;  %s45_s8 = sshll.u32 %s1339_s2, 4  ;;  %s46_s8 = int_to_ptr.hbm [resolvable:$true] %s45_s8 }
   0x9   :  { %26 = dma.hbm_to_vmem [thread:$0]  %s19_s25, 128, %s21_s29, [#allocation3], %s1248_s30, %s1248_s30, %s1249_s6  }
   0xa   :  { %s1250_s9 = smov [#allocation7]   ;;  %s55_s12 = sshll.u32 %s1340_s3, 4  ;;  %s56_s12 = int_to_ptr.hbm [resolvable:$true] %s55_s12 }
   0xb   :  { %s47_s10 = sshll.u32 %s1250_s9, 4  ;;  %s1251_s13 = smov [#allocation8]   ;;  %s48_s10 = int_to_ptr.vmem [resolvable:$true] %s47_s10 }
   0xc   :  { %50 = dma.hbm_to_vmem [thread:$0]  %s46_s8, 64, %s48_s10, [#allocation6]  }
   0xd   :  { %s57_s14 = sshll.u32 %s1251_s13, 4  ;;  %s58_s14 = int_to_ptr.vmem [resolvable:$true] %s57_s14 }
   0xe   :  { %63 = dma.hbm_to_vmem [thread:$0]  %s56_s12, 4096, %s58_s14, [#allocation9], %s1248_s30, %s1248_s30, %s1249_s6  }
   0xf   :  { %1236 = dma.done.wait [#allocation3], 128  }
  0x10   :  { %1237 = vsyncadd [#allocation3], 4294967168 }
  0x11   :  { %1238 = dma.done.wait [#allocation6], 4160  }
  0x12   :  { %1239 = vsyncadd [#allocation6], 4294963136 }
  0x13   :  { %1240 = dma.done.wait [#allocation9], 4096  }
  0x14   :  { %1241 = vsyncadd [#allocation9], 4294963200  ;;  %v881_v0 = vld [vmem:[#allocation5 + $0xe0] sm:$0xf]  ;;  %v1054_v1 = vld [vmem:[#allocation5 + $0xec] sm:$0xf0] }
  0x15   :  { %v1052_v2 = vld [vmem:[#allocation5 + $0xe4] sm:$0xf]  ;;  %v882_v3 = vor.u32 %v1054_v1, %v881_v0  ;;  %v883_v4 = vld [vmem:[#allocation5 + $0xf0] sm:$0xf0]  ;;  %v889_v5 = vld [vmem:[#allocation5 + $0xe8] sm:$0xf] }
  0x16   :  { %v1055_v6 = vld [vmem:[#allocation5 + $0xf4] sm:$0xf0]  ;;  %v886_v7 = vor.u32 %v1052_v2, %v883_v4  ;;  %v1053_v9 = vld [vmem:[#allocation5 + $0xec] sm:$0xf]  ;;  %v891_v10 = vld [vmem:[#allocation5 + $0xf8] sm:$0xf0] }
  0x17   :  { %v890_v8 = vor.u32 %v1055_v6, %v889_v5  ;;  %v865_v11 = vld [vmem:[#allocation5 + $0xc0] sm:$0xf]  ;;  %292 = vmatpush.bf16.msra.mxu0 %v882_v3  ;;  %v894_v12 = vor.u32 %v1053_v9, %v891_v10  ;;  %v1050_v13 = vld [vmem:[#allocation5 + $0xcc] sm:$0xf0]  ;;  %v1048_v14 = vld [vmem:[#allocation5 + $0xc4] sm:$0xf] }
  0x18   :  { %v867_v15 = vld [vmem:[#allocation5 + $0xd0] sm:$0xf0]  ;;  %306 = vmatpush.bf16.msra.mxu1 %v886_v7  ;;  %v866_v16 = vor.u32 %v1050_v13, %v865_v11  ;;  %v873_v18 = vld [vmem:[#allocation5 + $0xc8] sm:$0xf]  ;;  %v1051_v19 = vld [vmem:[#allocation5 + $0xd4] sm:$0xf0] }
  0x19   :  { %320 = vmatpush.bf16.msra.mxu2 %v890_v8  ;;  %v870_v17 = vor.u32 %v1048_v14, %v867_v15  ;;  %v1049_v20 = vld [vmem:[#allocation5 + $0xcc] sm:$0xf]  ;;  %334 = vmatpush.bf16.msra.mxu3 %v894_v12  ;;  %v874_v21 = vor.u32 %v1051_v19, %v873_v18  ;;  %v875_v22 = vld [vmem:[#allocation5 + $0xd8] sm:$0xf0]  ;;  %v849_v23 = vld [vmem:[#allocation5 + $0xa0] sm:$0xf] }
  0x1a   :  { %v1046_v24 = vld [vmem:[#allocation5 + $0xac] sm:$0xf0]  ;;  %v878_v25 = vor.u32 %v1049_v20, %v875_v22  ;;  %v1044_v26 = vld [vmem:[#allocation5 + $0xa4] sm:$0xf]  ;;  %v851_v27 = vld [vmem:[#allocation5 + $0xb0] sm:$0xf0] }
  0x1b   :  { %v857_v28 = vld [vmem:[#allocation5 + $0xa8] sm:$0xf]  ;;  %293 = vmatpush.bf16.msra.mxu0 %v866_v16  ;;  %v850_v29 = vor.u32 %v1046_v24, %v849_v23  ;;  %v1047_v30 = vld [vmem:[#allocation5 + $0xb4] sm:$0xf0]  ;;  %v1045_v31 = vld [vmem:[#allocation5 + $0xac] sm:$0xf]  ;;  %v854_v33 = vor.u32 %v1044_v26, %v851_v27 }
  0x1c   :  { %v859_v32 = vld [vmem:[#allocation5 + $0xb8] sm:$0xf0]  ;;  %307 = vmatpush.bf16.msra.mxu1 %v870_v17  ;;  %v858_v34 = vor.u32 %v1047_v30, %v857_v28  ;;  %v833_v35 = vld [vmem:[#allocation5 + $0x80] sm:$0xf]  ;;  %v1042_v36 = vld [vmem:[#allocation5 + $0x8c] sm:$0xf0] }
  0x1d   :  { %321 = vmatpush.bf16.msra.mxu2 %v874_v21  ;;  %v1040_v37 = vld [vmem:[#allocation5 + $0x84] sm:$0xf]  ;;  %335 = vmatpush.bf16.msra.mxu3 %v878_v25  ;;  %v862_v38 = vor.u32 %v1045_v31, %v859_v32  ;;  %v835_v39 = vld [vmem:[#allocation5 + $0x90] sm:$0xf0]  ;;  %v841_v40 = vld [vmem:[#allocation5 + $0x88] sm:$0xf]  ;;  %v834_v44 = vor.u32 %v1042_v36, %v833_v35 }
  0x1e   :  { %v1043_v41 = vld [vmem:[#allocation5 + $0x94] sm:$0xf0]  ;;  %v1041_v42 = vld [vmem:[#allocation5 + $0x8c] sm:$0xf]  ;;  %v843_v43 = vld [vmem:[#allocation5 + $0x98] sm:$0xf0]  ;;  %v838_v45 = vor.u32 %v1040_v37, %v835_v39 }
  0x1f   :  { %294 = vmatpush.bf16.msra.mxu0 %v850_v29  ;;  %v842_v46 = vor.u32 %v1043_v41, %v841_v40  ;;  %v817_v47 = vld [vmem:[#allocation5 + $0x60] sm:$0xf]  ;;  %v1038_v48 = vld [vmem:[#allocation5 + $0x6c] sm:$0xf0]  ;;  %v1036_v49 = vld [vmem:[#allocation5 + $0x64] sm:$0xf]  ;;  %v846_v50 = vor.u32 %v1041_v42, %v843_v43 }
  0x20   :  { %308 = vmatpush.bf16.msra.mxu1 %v854_v33  ;;  %v819_v51 = vld [vmem:[#allocation5 + $0x70] sm:$0xf0]  ;;  %v825_v52 = vld [vmem:[#allocation5 + $0x68] sm:$0xf]  ;;  %v1039_v53 = vld [vmem:[#allocation5 + $0x74] sm:$0xf0]  ;;  %v818_v56 = vor.u32 %v1038_v48, %v817_v47 }
  0x21   :  { %322 = vmatpush.bf16.msra.mxu2 %v858_v34  ;;  %336 = vmatpush.bf16.msra.mxu3 %v862_v38  ;;  %v1037_v54 = vld [vmem:[#allocation5 + $0x6c] sm:$0xf]  ;;  %v827_v55 = vld [vmem:[#allocation5 + $0x78] sm:$0xf0]  ;;  %v822_v57 = vor.u32 %v1036_v49, %v819_v51  ;;  %v826_v58 = vor.u32 %v1039_v53, %v825_v52  ;;  %v801_v59 = vld [vmem:[#allocation5 + $0x40] sm:$0xf] }
  0x22   :  { %v1034_v60 = vld [vmem:[#allocation5 + $0x4c] sm:$0xf0]  ;;  %v1032_v61 = vld [vmem:[#allocation5 + $0x44] sm:$0xf]  ;;  %v830_v62 = vor.u32 %v1037_v54, %v827_v55  ;;  %v803_v63 = vld [vmem:[#allocation5 + $0x50] sm:$0xf0] }
  0x23   :  { %295 = vmatpush.bf16.msra.mxu0 %v834_v44  ;;  %v809_v0 = vld [vmem:[#allocation5 + $0x48] sm:$0xf]  ;;  %v1035_v1 = vld [vmem:[#allocation5 + $0x54] sm:$0xf0]  ;;  %v1033_v2 = vld [vmem:[#allocation5 + $0x4c] sm:$0xf]  ;;  %v802_v4 = vor.u32 %v1034_v60, %v801_v59  ;;  %v806_v5 = vor.u32 %v1032_v61, %v803_v63 }
  0x24   :  { %309 = vmatpush.bf16.msra.mxu1 %v838_v45  ;;  %v811_v3 = vld [vmem:[#allocation5 + $0x58] sm:$0xf0]  ;;  %v810_v6 = vor.u32 %v1035_v1, %v809_v0  ;;  %v785_v7 = vld [vmem:[#allocation5 + $0x20] sm:$0xf]  ;;  %v1030_v8 = vld [vmem:[#allocation5 + $0x2c] sm:$0xf0] }
  0x25   :  { %323 = vmatpush.bf16.msra.mxu2 %v842_v46  ;;  %337 = vmatpush.bf16.msra.mxu3 %v846_v50  ;;  %v1028_v9 = vld [vmem:[#allocation5 + $0x24] sm:$0xf]  ;;  %v814_v10 = vor.u32 %v1033_v2, %v811_v3  ;;  %v787_v11 = vld [vmem:[#allocation5 + $0x30] sm:$0xf0]  ;;  %v793_v12 = vld [vmem:[#allocation5 + $0x28] sm:$0xf]  ;;  %v786_v16 = vor.u32 %v1030_v8, %v785_v7 }
  0x26   :  { %v1031_v13 = vld [vmem:[#allocation5 + $0x34] sm:$0xf0]  ;;  %v1029_v14 = vld [vmem:[#allocation5 + $0x2c] sm:$0xf]  ;;  %v795_v15 = vld [vmem:[#allocation5 + $0x38] sm:$0xf0]  ;;  %v790_v17 = vor.u32 %v1028_v9, %v787_v11 }
  0x27   :  { %296 = vmatpush.bf16.msra.mxu0 %v818_v56  ;;  %v794_v18 = vor.u32 %v1031_v13, %v793_v12  ;;  %v769_v19 = vld [vmem:[#allocation5] sm:$0xf]  ;;  %v1026_v20 = vld [vmem:[#allocation5 + $0xc] sm:$0xf0]  ;;  %v1024_v21 = vld [vmem:[#allocation5 + $0x4] sm:$0xf]  ;;  %v798_v22 = vor.u32 %v1029_v14, %v795_v15 }
  0x28   :  { %310 = vmatpush.bf16.msra.mxu1 %v822_v57  ;;  %v771_v23 = vld [vmem:[#allocation5 + $0x10] sm:$0xf0]  ;;  %v777_v24 = vld [vmem:[#allocation5 + $0x8] sm:$0xf]  ;;  %v1027_v25 = vld [vmem:[#allocation5 + $0x14] sm:$0xf0]  ;;  %v770_v28 = vor.u32 %v1026_v20, %v769_v19 }
  0x29   :  { %324 = vmatpush.bf16.msra.mxu2 %v826_v58  ;;  %338 = vmatpush.bf16.msra.mxu3 %v830_v62  ;;  %v1025_v26 = vld [vmem:[#allocation5 + $0xc] sm:$0xf]  ;;  %v779_v27 = vld [vmem:[#allocation5 + $0x18] sm:$0xf0]  ;;  %v774_v29 = vor.u32 %v1024_v21, %v771_v23  ;;  %v778_v30 = vor.u32 %v1027_v25, %v777_v24  ;;  %v1062_v35 = vld [vmem:[#allocation8 + $0x30] sm:$0xff]  ;;  %s1252_s15 = smov [#allocation10]  }
  0x2a   :  { %v782_v31 = vor.u32 %v1025_v26, %v779_v27  ;;  %v1023_v32 = vld [vmem:[#allocation2] sm:$0xff]  ;;  %v1061_v39 = vld [vmem:[#allocation8 + $0x28] sm:$0xff]  ;;  %v1060_v43 = vld [vmem:[#allocation8 + $0x20] sm:$0xff]  ;;  %s746_s16 = sshll.u32 %s1252_s15, 4  ;;  %s748_s19 = sshll.u32 %s1342_s5, 4  ;;  %s747_s16 = int_to_ptr.vmem [resolvable:$true] %s746_s16  ;;  %s749_s19 = int_to_ptr.hbm [resolvable:$true] %s748_s19 }
  0x2b   :  { %297 = vmatpush.bf16.msra.mxu0 %v802_v4  ;;  %v1063_v33 = vld [vmem:[#allocation8 + $0x38] sm:$0xff]  ;;  %v1070_v36 = vld [vmem:[#allocation8 + $0x70] sm:$0xff]  ;;  %v1069_v40 = vld [vmem:[#allocation8 + $0x68] sm:$0xff]  ;;  %s1254_s20 = smov 8  }
  0x2c   :  { %311 = vmatpush.bf16.msra.mxu1 %v806_v5  ;;  %v1071_v34 = vld [vmem:[#allocation8 + $0x78] sm:$0xff]  ;;  %v1078_v41 = vld [vmem:[#allocation8 + $0xb0] sm:$0xff]  ;;  %v1068_v44 = vld [vmem:[#allocation8 + $0x60] sm:$0xff] }
  0x2d   :  { %325 = vmatpush.bf16.msra.mxu2 %v810_v6  ;;  %339 = vmatpush.bf16.msra.mxu3 %v814_v10  ;;  %v1079_v37 = vld [vmem:[#allocation8 + $0xb8] sm:$0xff]  ;;  %v1086_v42 = vld [vmem:[#allocation8 + $0xf0] sm:$0xff]  ;;  %v1077_v45 = vld [vmem:[#allocation8 + $0xa8] sm:$0xff] }
  0x2e   :  { %v1087_v38 = vld [vmem:[#allocation8 + $0xf8] sm:$0xff]  ;;  %v1085_v46 = vld [vmem:[#allocation8 + $0xe8] sm:$0xff]  ;;  %v1076_v49 = vld [vmem:[#allocation8 + $0xa0] sm:$0xff] }
  0x2f   :  { %298 = vmatpush.bf16.msra.mxu0 %v786_v16  ;;  %v1059_v47 = vld [vmem:[#allocation8 + $0x18] sm:$0xff]  ;;  %v1084_v50 = vld [vmem:[#allocation8 + $0xe0] sm:$0xff]  ;;  %v1058_v51 = vld [vmem:[#allocation8 + $0x10] sm:$0xff] }
  0x30   :  { %312 = vmatpush.bf16.msra.mxu1 %v790_v17  ;;  %v1067_v48 = vld [vmem:[#allocation8 + $0x58] sm:$0xff]  ;;  %v1066_v52 = vld [vmem:[#allocation8 + $0x50] sm:$0xff]  ;;  %v1057_v55 = vld [vmem:[#allocation8 + $0x8] sm:$0xff] }
  0x31   :  { %326 = vmatpush.bf16.msra.mxu2 %v794_v18  ;;  %340 = vmatpush.bf16.msra.mxu3 %v798_v22  ;;  %v1075_v53 = vld [vmem:[#allocation8 + $0x98] sm:$0xff]  ;;  %v1065_v56 = vld [vmem:[#allocation8 + $0x48] sm:$0xff]  ;;  %v1074_v58 = vld [vmem:[#allocation8 + $0x90] sm:$0xff] }
  0x32   :  { %v1083_v54 = vld [vmem:[#allocation8 + $0xd8] sm:$0xff]  ;;  %v1082_v59 = vld [vmem:[#allocation8 + $0xd0] sm:$0xff]  ;;  %v1056_v61 = vld [vmem:[#allocation8] sm:$0xff] }
  0x33   :  { %299 = vmatpush.bf16.msra.mxu0 %v770_v28  ;;  %v1297_v57 = vld [vmem:[#allocation7] sm:$0xf]  ;;  %v1064_v62 = vld [vmem:[#allocation8 + $0x40] sm:$0xff]  ;;  %v1073_v0 = vld [vmem:[#allocation8 + $0x88] sm:$0xff] }
  0x34   :  { %313 = vmatpush.bf16.msra.mxu1 %v774_v29  ;;  %v118_v60 = vperm.slane %v1297_v57, 0  ;;  %v119_v63 = vperm.slane %v1297_v57, 1  ;;  %v1081_v1 = vld [vmem:[#allocation8 + $0xc8] sm:$0xff]  ;;  %v1072_v7 = vld [vmem:[#allocation8 + $0x80] sm:$0xff]  ;;  %v120_v10 = vperm.slane %v1297_v57, 2  ;;  %v121_v12 = vperm.slane %v1297_v57, 3 }
  0x35   :  { %327 = vmatpush.bf16.msra.mxu2 %v778_v30  ;;  %341 = vmatpush.bf16.msra.mxu3 %v782_v31  ;;  %v1080_v8 = vld [vmem:[#allocation8 + $0xc0] sm:$0xff] }
  0x36   :  { %300 = vmatmul.bf16.vlgmr.msra.gmra.mxu0 %v1023_v32 }
  0x37   :  { %314 = vmatmul.bf16.vlgmr.msra.gmra.mxu1 %v1023_v32  ;;  %684 = vmatpush.bf16.msrb.mxu0 %v1063_v33 }
  0x38   :  { %328 = vmatmul.bf16.vlgmr.msra.gmra.mxu2 %v1023_v32  ;;  %342 = vmatmul.bf16.vlgmr.msra.gmra.mxu3 %v1023_v32 }
  0x39   :  { %698 = vmatpush.bf16.msrb.mxu1 %v1071_v34  ;;  %712 = vmatpush.bf16.msrb.mxu2 %v1079_v37 }
  0x3a   :  { %726 = vmatpush.bf16.msrb.mxu3 %v1087_v38 }
  0x3b   :  { %685 = vmatpush.bf16.msrb.mxu0 %v1062_v35 }
  0x3d   :  { %699 = vmatpush.bf16.msrb.mxu1 %v1070_v36  ;;  %713 = vmatpush.bf16.msrb.mxu2 %v1078_v41 }
  0x3e   :  { %727 = vmatpush.bf16.msrb.mxu3 %v1086_v42 }
  0x3f   :  { %686 = vmatpush.bf16.msrb.mxu0 %v1061_v39 }
  0x41   :  { %700 = vmatpush.bf16.msrb.mxu1 %v1069_v40  ;;  %714 = vmatpush.bf16.msrb.mxu2 %v1077_v45 }
  0x42   :  { %728 = vmatpush.bf16.msrb.mxu3 %v1085_v46 }
  0x43   :  { %687 = vmatpush.bf16.msrb.mxu0 %v1060_v43 }
  0x45   :  { %701 = vmatpush.bf16.msrb.mxu1 %v1068_v44  ;;  %715 = vmatpush.bf16.msrb.mxu2 %v1076_v49 }
  0x46   :  { %729 = vmatpush.bf16.msrb.mxu3 %v1084_v50 }
  0x47   :  { %688 = vmatpush.bf16.msrb.mxu0 %v1059_v47 }
  0x49   :  { %702 = vmatpush.bf16.msrb.mxu1 %v1067_v48  ;;  %716 = vmatpush.bf16.msrb.mxu2 %v1075_v53 }
  0x4a   :  { %730 = vmatpush.bf16.msrb.mxu3 %v1083_v54 }
  0x4b   :  { %689 = vmatpush.bf16.msrb.mxu0 %v1058_v51 }
  0x4d   :  { %703 = vmatpush.bf16.msrb.mxu1 %v1066_v52  ;;  %717 = vmatpush.bf16.msrb.mxu2 %v1074_v58 }
  0x4e   :  { %731 = vmatpush.bf16.msrb.mxu3 %v1082_v59 }
  0x4f   :  { %690 = vmatpush.bf16.msrb.mxu0 %v1057_v55 }
  0x51   :  { %704 = vmatpush.bf16.msrb.mxu1 %v1065_v56  ;;  %718 = vmatpush.bf16.msrb.mxu2 %v1073_v0 }
  0x52   :  { %732 = vmatpush.bf16.msrb.mxu3 %v1081_v1 }
  0x53   :  { %691 = vmatpush.bf16.msrb.mxu0 %v1056_v61 }
  0x55   :  { %705 = vmatpush.bf16.msrb.mxu1 %v1064_v62  ;;  %719 = vmatpush.bf16.msrb.mxu2 %v1072_v7 }
  0x56   :  { %733 = vmatpush.bf16.msrb.mxu3 %v1080_v8 }
  0xb3   :  { %v301_v2 = vpop.f32.mrf.mxu0 }
  0xb4   :  { %v1301_v3 = vadd.f32 %v301_v2, %v118_v60  ;;  %v315_v4 = vpop.f32.mrf.mxu1 }
  0xb5   :  { %v1303_v5 = vadd.f32 %v315_v4, %v119_v63 }
  0xb6   :  { %v356_v6 = vmul.f32 0.044715, %v1301_v3 }
  0xb7   :  { %v357_v9 = vmul.f32 0.044715, %v1303_v5 }
  0xb8   :  { %v364_v11 = vmul.f32 %v356_v6, %v1301_v3  ;;  %v348_v6 = vmul.f32 0.5, %v1301_v3 }
  0xb9   :  { %v365_v13 = vmul.f32 %v357_v9, %v1303_v5  ;;  %v349_v9 = vmul.f32 0.5, %v1303_v5 }
  0xba   :  { %v372_v15 = vmul.f32 %v364_v11, %v1301_v3 }
  0xbb   :  { %v329_v14 = vpop.f32.mrf.mxu2  ;;  %v343_v17 = vpop.f32.mrf.mxu3  ;;  %v373_v19 = vmul.f32 %v365_v13, %v1303_v5 }
  0xbc   :  { %v1312_v16 = vadd.f32 %v329_v14, %v120_v10  ;;  %v303_v18 = vpop.f32.mrf.mxu0  ;;  %v1315_v20 = vadd.f32 %v343_v17, %v121_v12  ;;  %v317_v22 = vpop.f32.mrf.mxu1  ;;  %v380_v23 = vadd.f32 %v372_v15, %v1301_v3 }
  0xbd   :  { %v304_v21 = vadd.f32 %v303_v18, %v118_v60  ;;  %v318_v25 = vadd.f32 %v317_v22, %v119_v63  ;;  %v381_v26 = vadd.f32 %v373_v19, %v1303_v5 }
  0xbe   :  { %v358_v24 = vmul.f32 0.044715, %v1312_v16  ;;  %v359_v27 = vmul.f32 0.044715, %v1315_v20  ;;  %v388_v33 = vmul.f32 0.7978846, %v380_v23 }
  0xbf   :  { %v360_v28 = vmul.f32 0.044715, %v304_v21  ;;  %v361_v30 = vmul.f32 0.044715, %v318_v25  ;;  %v389_v35 = vmul.f32 0.7978846, %v381_v26 }
  0xc0   :  { %v366_v29 = vmul.f32 %v358_v24, %v1312_v16  ;;  %v367_v31 = vmul.f32 %v359_v27, %v1315_v20  ;;  %1100 = vtanh.f32 %v388_v33  ;;  %v352_v7 = vmul.f32 0.5, %v304_v21 }
  0xc1   :  { %v368_v32 = vmul.f32 %v360_v28, %v304_v21  ;;  %v369_v34 = vmul.f32 %v361_v30, %v318_v25  ;;  %1102 = vtanh.f32 %v389_v35  ;;  %v350_v26 = vmul.f32 0.5, %v1312_v16 }
  0xc2   :  { %v374_v36 = vmul.f32 %v366_v29, %v1312_v16  ;;  %v375_v39 = vmul.f32 %v367_v31, %v1315_v20  ;;  %v351_v27 = vmul.f32 0.5, %v1315_v20 }
  0xc3   :  { %v331_v37 = vpop.f32.mrf.mxu2  ;;  %v376_v38 = vmul.f32 %v368_v32, %v304_v21  ;;  %v345_v41 = vpop.f32.mrf.mxu3  ;;  %v377_v42 = vmul.f32 %v369_v34, %v318_v25 }
  0xc4   :  { %v332_v40 = vadd.f32 %v331_v37, %v120_v10  ;;  %v382_v43 = vadd.f32 %v374_v36, %v1312_v16  ;;  %v346_v44 = vadd.f32 %v345_v41, %v121_v12  ;;  %v383_v46 = vadd.f32 %v375_v39, %v1315_v20  ;;  %v1099_v37 = vld [vmem:[%s1341_s4] ss:$0 sm:$0xff]  ;;  %s1253_s4 = smov 128  }
  0xc5   :  { %v384_v45 = vadd.f32 %v376_v38, %v304_v21  ;;  %v385_v48 = vadd.f32 %v377_v42, %v318_v25  ;;  %v353_v10 = vmul.f32 0.5, %v318_v25 }
  0xc6   :  { %v362_v47 = vmul.f32 0.044715, %v332_v40  ;;  %v363_v49 = vmul.f32 0.044715, %v346_v44  ;;  %v390_v53 = vmul.f32 0.7978846, %v382_v43  ;;  %v1101_v57 = vpop.eup %1100 }
  0xc7   :  { %v392_v50 = vmul.f32 0.7978846, %v384_v45  ;;  %v393_v52 = vmul.f32 0.7978846, %v385_v48  ;;  %v391_v55 = vmul.f32 0.7978846, %v383_v46  ;;  %v1103_v59 = vpop.eup %1102 }
  0xc8   :  { %v370_v51 = vmul.f32 %v362_v47, %v332_v40  ;;  %v371_v54 = vmul.f32 %v363_v49, %v346_v44  ;;  %v404_v62 = vadd.f32 1.0, %v1101_v57  ;;  %v405_v1 = vadd.f32 1.0, %v1103_v59 }
  0xc9   :  { %1104 = vtanh.f32 %v392_v50  ;;  %v354_v5 = vmul.f32 0.5, %v332_v40  ;;  %v355_v28 = vmul.f32 0.5, %v346_v44 }
  0xca   :  { %1106 = vtanh.f32 %v393_v52  ;;  %v378_v56 = vmul.f32 %v370_v51, %v332_v40  ;;  %v379_v58 = vmul.f32 %v371_v54, %v346_v44  ;;  %v412_v13 = vmul.f32 %v404_v62, %v348_v6 }
  0xcb   :  { %1108 = vtanh.f32 %v390_v53  ;;  %v413_v17 = vmul.f32 %v405_v1, %v349_v9 }
  0xcc   :  { %v386_v60 = vadd.f32 %v378_v56, %v332_v40  ;;  %v387_v61 = vadd.f32 %v379_v58, %v346_v44  ;;  %1110 = vtanh.f32 %v391_v55 }
  0xce   :  { %v394_v63 = vmul.f32 0.7978846, %v386_v60  ;;  %v395_v2 = vmul.f32 0.7978846, %v387_v61 }
  0xcf   :  { %v1105_v0 = vpop.eup %1104 }
  0xd0   :  { %v1107_v4 = vpop.eup %1106  ;;  %v408_v8 = vadd.f32 1.0, %v1105_v0  ;;  %1112 = vtanh.f32 %v394_v63 }
  0xd1   :  { %v409_v11 = vadd.f32 1.0, %v1107_v4  ;;  %1114 = vtanh.f32 %v395_v2  ;;  %v1109_v12 = vpop.eup %1108 }
  0xd2   :  { %v416_v14 = vmul.f32 %v408_v8, %v352_v7  ;;  %v1111_v15 = vpop.eup %1110  ;;  %v406_v23 = vadd.f32 1.0, %v1109_v12 }
  0xd3   :  { %v417_v18 = vmul.f32 %v409_v11, %v353_v10  ;;  %v407_v3 = vadd.f32 1.0, %v1111_v15 }
  0xd4   :  { %v420_v19 = vpack.c.bf16 %v416_v14, %v412_v13  ;;  %v414_v30 = vmul.f32 %v406_v23, %v350_v26 }
  0xd5   :  { %v421_v22 = vpack.c.bf16 %v417_v18, %v413_v17  ;;  %v415_v32 = vmul.f32 %v407_v3, %v351_v27 }
  0xd6   :  { %v1113_v24 = vpop.eup %1112  ;;  %692 = vmatmul.bf16.vlgmr.msrb.gmra.mxu0 %v420_v19 }
  0xd7   :  { %v1115_v21 = vpop.eup %1114  ;;  %706 = vmatmul.bf16.vlgmr.msrb.gmra.mxu1 %v421_v22  ;;  %v410_v25 = vadd.f32 1.0, %v1113_v24 }
  0xd8   :  { %v411_v29 = vadd.f32 1.0, %v1115_v21 }
  0xd9   :  { %v418_v31 = vmul.f32 %v410_v25, %v354_v5 }
  0xda   :  { %v419_v33 = vmul.f32 %v411_v29, %v355_v28 }
  0xdb   :  { %v422_v34 = vpack.c.bf16 %v418_v31, %v414_v30 }
  0xdc   :  { %v423_v35 = vpack.c.bf16 %v419_v33, %v415_v32 }
  0xdd   :  { %720 = vmatmul.bf16.vlgmr.msrb.gmra.mxu2 %v422_v34 }
  0xde   :  { %734 = vmatmul.bf16.vlgmr.msrb.gmra.mxu3 %v423_v35 }
 0x153   :  { %v693_v36 = vpop.f32.mrf.mxu0 }
 0x154   :  { %v694_v16 = vadd.f32 %v1099_v37, %v693_v36  ;;  %v707_v38 = vpop.f32.mrf.mxu1 }
 0x156   :  { %v708_v39 = vadd.f32 %v707_v38, %v694_v16 }
 0x15b   :  { %v695_v40 = vpop.f32.mrf.mxu0 }
 0x15c   :  { %v696_v43 = vadd.f32 %v1099_v37, %v695_v40  ;;  %v709_v45 = vpop.f32.mrf.mxu1 }
 0x15e   :  { %v710_v46 = vadd.f32 %v709_v45, %v696_v43 }
 0x160   :  { %v721_v20 = vpop.f32.mrf.mxu2 }
 0x161   :  { %v722_v41 = vadd.f32 %v721_v20, %v708_v39  ;;  %v735_v42 = vpop.f32.mrf.mxu3 }
 0x163   :  { %v736_v44 = vadd.f32 %v735_v42, %v722_v41 }
 0x165   :  { %740 = vst [vmem:[#allocation10] sm:$0xff] %v736_v44 }
 0x168   :  { %v723_v47 = vpop.f32.mrf.mxu2 }
 0x169   :  { %v724_v48 = vadd.f32 %v723_v47, %v710_v46  ;;  %v737_v49 = vpop.f32.mrf.mxu3 }
 0x16b   :  { %v738_v50 = vadd.f32 %v737_v49, %v724_v48 }
 0x16d   :  { %741 = vst [vmem:[#allocation10 + $0x8] sm:$0xff] %v738_v50 }
 0x16e   :  { %754 = dma.vmem_to_hbm [thread:$0]  %s747_s16, 256, %s749_s19, [#allocation4], %s1253_s4, %s1253_s4, %s1254_s20  }
 0x16f   :  { %1242 = dma.done.wait [#allocation4], 256  }
 0x170   :  { %1243 = vsyncadd [#allocation4], 4294967040 }
 0x171   :  { %759 = vsyncpa [#allocation3], 1 }
 0x172   :  { %760 = vsyncpa [#allocation6], 1 }
 0x173   :  { %761 = vsyncpa [#allocation9], 1 }
 0x174   :  { %762 = vsyncpa [#allocation4], 1 }

</bundles_post_ra>
